<compile_context>
chip_gen: v6e
topology: v6e:2x2x1
jax: 0.10.0
libtpu: 0.0.40
codegen_flags: <defaults>
</compile_context>

<pallas_src>
import jax
import jax.numpy as jnp
from jax.experimental import pallas as pl
from jax.experimental.pallas import tpu as pltpu


def _gaussian_kernel(t_ref, c_ref, o_ref):
    # t_ref: (TM, 1) float32   -- t = mul*x + bias
    # c_ref: (8, K)  float32   -- row 0: scale, row 1: shift, row 2: coef
    # o_ref: (TM, K) out dtype
    t = t_ref[...]                     # (TM, 1)
    c = c_ref[...]                     # (8, K)
    scale = c[0:1, :]                  # (1, K) =  inv_std * sqrt(0.5)
    shift = c[1:2, :]                  # (1, K) = -mean * inv_std * sqrt(0.5)
    coef = c[2:3, :]                   # (1, K) =  inv_std / sqrt(2*pi)

    u = t * scale + shift              # broadcast -> (TM, K)
    o_ref[...] = (jnp.exp(-(u * u)) * coef).astype(o_ref.dtype)


def gaussian_layer_forward(x, edge_type, means_w, stds_w, mul_w, bias_w,
                           *, tile_m=4096):
    """x: (B, N, N) float; edge_type: (B, N, N) int32.

    means_w, stds_w: (1, K) float32 embedding weights.
    mul_w, bias_w:   (edge_types, 1) float32 embedding weights.
    Returns (B, N, N, K) in means_w.dtype.
    """
    B, N1, N2 = x.shape
    K = means_w.shape[-1]
    M = B * N1 * N2
    out_dtype = means_w.dtype

    # --- Glue (tiny (M,1) work, fused by XLA): gathers + affine. ---
    mul = mul_w[edge_type, 0].astype(x.dtype)        # (B, N, N)
    bias = bias_w[edge_type, 0].astype(x.dtype)      # (B, N, N)
    t = (mul * x + bias).astype(jnp.float32).reshape(M, 1)

    # --- Precompute per-kernel constants on the (1,K) vectors. ---
    pi = 3.14159                                     # matches torch.jit constant
    a = (2.0 * pi) ** 0.5
    mean = means_w.astype(jnp.float32).reshape(1, K)
    std = jnp.abs(stds_w.astype(jnp.float32).reshape(1, K)) + 1e-5
    inv_std = 1.0 / std
    scale = inv_std * (0.5 ** 0.5)                   # fold the -0.5 into the square
    shift = -mean * scale
    coef = inv_std / a
    consts = jnp.concatenate(
        [scale, shift, coef, jnp.zeros((5, K), jnp.float32)], axis=0)  # (8, K)

    # --- Tile choice: multiple of 8 sublanes, no full-array padding. ---
    tm = max(8, (min(tile_m, M) // 8) * 8)
    Mp = M
    t_f = t
    if Mp < tm:                      # only hit when M < 8
        t_f = jnp.pad(t_f, ((0, tm - Mp), (0, 0)))
        Mp = tm

    grid = (pl.cdiv(Mp, tm),)
    out = pl.pallas_call(
        _gaussian_kernel,
        out_shape=jax.ShapeDtypeStruct((Mp, K), out_dtype),
        grid_spec=pltpu.PrefetchScalarGridSpec(
            num_scalar_prefetch=0,
            grid=grid,
            in_specs=[
                pl.BlockSpec((tm, 1), lambda i: (i, 0)),  # t
                pl.BlockSpec((8, K), lambda i: (0, 0)),   # packed constants
            ],
            out_specs=pl.BlockSpec((tm, K), lambda i: (i, 0)),
        ),
        compiler_params=pltpu.CompilerParams(
            dimension_semantics=("parallel",)),
    )(t_f, consts)

    if Mp != M:
        out = out[:M]
    return out.reshape(B, N1, N2, K)


def _reference(x, edge_type, means_w, stds_w, mul_w, bias_w):
    # Pure-JAX reference mirroring the PyTorch forward.
    K = means_w.shape[-1]
    mul = mul_w[edge_type].astype(x.dtype)          # (B,N,N,1)
    bias = bias_w[edge_type].astype(x.dtype)        # (B,N,N,1)
    t = mul * x[..., None] + bias                   # (B,N,N,1)
    t = jnp.broadcast_to(t, t.shape[:-1] + (K,)).astype(jnp.float32)
    mean = means_w.astype(jnp.float32).reshape(-1)
    std = jnp.abs(stds_w.astype(jnp.float32).reshape(-1)) + 1e-5
    pi = 3.14159
    a = (2.0 * pi) ** 0.5
    return (jnp.exp(-0.5 * ((t - mean) / std) ** 2) / (a * std)).astype(means_w.dtype)


if __name__ == "__main__":
    K = 128
    edge_types = 1024
    B, N = 2, 16

    key = jax.random.PRNGKey(0)
    k_means, k_stds, k_x, k_et = jax.random.split(key, 4)

    # Deterministic parameter init mirroring the module's __init__.
    means_w = jax.random.uniform(k_means, (1, K), jnp.float32, 0.0, 3.0)
    stds_w = jax.random.uniform(k_stds, (1, K), jnp.float32, 0.0, 3.0)
    mul_w = jnp.ones((edge_types, 1), jnp.float32)    # nn.init.constant_(1)
    bias_w = jnp.zeros((edge_types, 1), jnp.float32)  # nn.init.constant_(0)

    x = jax.random.normal(k_x, (B, N, N), jnp.float32) * 2.0
    edge_type = jax.random.randint(k_et, (B, N, N), 0, edge_types, jnp.int32)

    out = gaussian_layer_forward(x, edge_type, means_w, stds_w, mul_w, bias_w)
    out = jax.block_until_ready(out)

    ref = _reference(x, edge_type, means_w, stds_w, mul_w, bias_w)
    assert out.shape == (B, N, N, K), out.shape
    assert out.dtype == means_w.dtype, out.dtype
    assert jnp.allclose(out, ref, atol=1e-5, rtol=1e-4), "mismatch vs reference"

    print("KERNEL_OK")
</pallas_src>

<mosaic_0001>
module attributes {stable_mosaic.version = 11 : i64} {
  func.func @_gaussian_kernel(%arg0: i32, %arg1: memref<512x1xf32, #tpu.memory_space<vmem>>, %arg2: memref<8x128xf32, #tpu.memory_space<vmem>>, %arg3: memref<512x128xf32, #tpu.memory_space<vmem>>) attributes {dimension_semantics = [#tpu.dimension_semantics<parallel>], iteration_bounds = array<i64: 1>, scalar_prefetch = 0 : i64, scratch_operands = 0 : i64, tpu.core_type = #tpu.core_type<tc>, window_params = [{transform_indices = @transform_0, window_bounds = array<i64: 512, 1>}, {pipeline_mode = #tpu.pipeline_mode<synchronous>, transform_indices = @transform_1, window_bounds = array<i64: 8, 128>}, {transform_indices = @transform_2, window_bounds = array<i64: 512, 128>}]} {
    %c0 = arith.constant 0 : index
    %c0_0 = arith.constant 0 : index
    %0 = vector.load %arg1[%c0, %c0_0] : memref<512x1xf32, #tpu.memory_space<vmem>>, vector<512x1xf32>
    %c0_1 = arith.constant 0 : index
    %c0_2 = arith.constant 0 : index
    %1 = vector.load %arg2[%c0_1, %c0_2] : memref<8x128xf32, #tpu.memory_space<vmem>>, vector<8x128xf32>
    %2 = vector.extract_strided_slice %1 {offsets = [0, 0], sizes = [1, 128], strides = [1, 1]} : vector<8x128xf32> to vector<1x128xf32>
    %3 = vector.extract_strided_slice %1 {offsets = [1, 0], sizes = [1, 128], strides = [1, 1]} : vector<8x128xf32> to vector<1x128xf32>
    %4 = vector.extract_strided_slice %1 {offsets = [2, 0], sizes = [1, 128], strides = [1, 1]} : vector<8x128xf32> to vector<1x128xf32>
    %5 = vector.broadcast %0 : vector<512x1xf32> to vector<512x128xf32>
    %6 = vector.broadcast %2 : vector<1x128xf32> to vector<512x128xf32>
    %7 = arith.mulf %5, %6 : vector<512x128xf32>
    %8 = vector.broadcast %3 : vector<1x128xf32> to vector<512x128xf32>
    %9 = arith.addf %7, %8 : vector<512x128xf32>
    %10 = arith.mulf %9, %9 : vector<512x128xf32>
    %cst = arith.constant 0.000000e+00 : f32
    %11 = vector.broadcast %cst : f32 to vector<512x128xf32>
    %12 = arith.subf %11, %10 : vector<512x128xf32>
    %13 = math.exp %12 : vector<512x128xf32>
    %14 = vector.broadcast %4 : vector<1x128xf32> to vector<512x128xf32>
    %15 = arith.mulf %13, %14 : vector<512x128xf32>
    %c0_3 = arith.constant 0 : index
    %c0_4 = arith.constant 0 : index
    %16 = vector.load %arg3[%c0_3, %c0_4] : memref<512x128xf32, #tpu.memory_space<vmem>>, vector<512x128xf32>
    tpu.vector_store %arg3[%c0_3, %c0_4], %15 {strides = array<i32>} : memref<512x128xf32, #tpu.memory_space<vmem>>, vector<512x128xf32>,
    return
  }
  func.func @transform_0(%arg0: i32) -> (i32, i32) {
    %c0_i32 = arith.constant 0 : i32
    %c0_i32_0 = arith.constant 0 : i32
    return %arg0, %c0_i32 : i32, i32
  }
  func.func @transform_1(%arg0: i32) -> (i32, i32) {
    %c0_i32 = arith.constant 0 : i32
    %c0_i32_0 = arith.constant 0 : i32
    %c0_i32_1 = arith.constant 0 : i32
    return %c0_i32, %c0_i32_0 : i32, i32
  }
  func.func @transform_2(%arg0: i32) -> (i32, i32) {
    %c0_i32 = arith.constant 0 : i32
    %c0_i32_0 = arith.constant 0 : i32
    return %arg0, %c0_i32 : i32, i32
  }
}

</mosaic_0001>

<bundles_post_ra>
// kernel: tpu_custom_call.1
= control target key start
LH: loop header
LB: loop body
LE: loop exit
PB: predicated region body
PF: predicated region fallthrough
CT: control target
= control target key end

     0   :  { %v1093_v2 = vmov 0   ;;  %s1518_s0 = inlined_call_operand.vmem [shape: f32[512,1], index: 0, kind: input, shape index: {}]   ;;  %s1519_s1 = inlined_call_operand.vmem [shape: f32[8,128], index: 1, kind: input, shape index: {}]   ;;  %s1520_s2 = inlined_call_operand.hbm [shape: f32[512,128], index: 2, kind: output, shape index: {}]  }
   0x1   :  { %v14_v0 = vld [vmem:[%s1518_s0 + $0x10] sm:$0xff]  ;;  %v12_v1 = vld [vmem:[%s1518_s0] sm:$0xff]  ;;  %942 = vset.pattern.permute.xlu1 %v1093_v2  ;;  %941 = vset.pattern.permute.xlu0 %v1093_v2  ;;  %v15_v3 = vld [vmem:[%s1518_s0 + $0x18] sm:$0xff] }
   0x2   :  { %89 = vperm.xlu1 %942, %v14_v0   ;;  %79 = vperm.xlu0 %941, %v12_v1   ;;  %v13_v4 = vld [vmem:[%s1518_s0 + $0x8] sm:$0xff]  ;;  %v16_v6 = vld [vmem:[%s1518_s0 + $0x20] sm:$0xff]  ;;  %v19_v7 = vld [vmem:[%s1518_s0 + $0x38] sm:$0xff] }
   0x3   :  { %v17_v5 = vld [vmem:[%s1518_s0 + $0x28] sm:$0xff]  ;;  %v18_v8 = vld [vmem:[%s1518_s0 + $0x30] sm:$0xff]  ;;  %v20_v10 = vld [vmem:[%s1518_s0 + $0x40] sm:$0xff] }
   0x4   :  { %v21_v9 = vld [vmem:[%s1518_s0 + $0x48] sm:$0xff]  ;;  %v23_v11 = vld [vmem:[%s1518_s0 + $0x58] sm:$0xff]  ;;  %v22_v12 = vld [vmem:[%s1518_s0 + $0x50] sm:$0xff] }
   0x6   :  { %94 = vperm.xlu1 %942, %v15_v3   ;;  %84 = vperm.xlu0 %941, %v13_v4  }
   0xa   :  { %104 = vperm.xlu1 %942, %v17_v5   ;;  %99 = vperm.xlu0 %941, %v16_v6  }
   0xe   :  { %114 = vperm.xlu1 %942, %v19_v7   ;;  %109 = vperm.xlu0 %941, %v18_v8  }
  0x12   :  { %124 = vperm.xlu1 %942, %v21_v9   ;;  %119 = vperm.xlu0 %941, %v20_v10  }
  0x13   :  { %7 = vsyncpa [#allocation3], 0  ;;  %v25_v13 = vld [vmem:[%s1518_s0 + $0x68] sm:$0xff]  ;;  %v24_v14 = vld [vmem:[%s1518_s0 + $0x60] sm:$0xff]  ;;  %v397_v57 = vlaneseq }
  0x14   :  { %v27_v15 = vld [vmem:[%s1518_s0 + $0x78] sm:$0xff]  ;;  %v26_v16 = vld [vmem:[%s1518_s0 + $0x70] sm:$0xff]  ;;  %v29_v17 = vld [vmem:[%s1518_s0 + $0x88] sm:$0xff] }
  0x15   :  { %v28_v18 = vld [vmem:[%s1518_s0 + $0x80] sm:$0xff]  ;;  %v31_v19 = vld [vmem:[%s1518_s0 + $0x98] sm:$0xff]  ;;  %v30_v20 = vld [vmem:[%s1518_s0 + $0x90] sm:$0xff]  ;;  %v1286_v60 = vshrl.u32 %v397_v57, 7 }
  0x16   :  { %134 = vperm.xlu1 %942, %v23_v11   ;;  %129 = vperm.xlu0 %941, %v22_v12   ;;  %v33_v21 = vld [vmem:[%s1518_s0 + $0xa8] sm:$0xff]  ;;  %v32_v22 = vld [vmem:[%s1518_s0 + $0xa0] sm:$0xff]  ;;  %v35_v23 = vld [vmem:[%s1518_s0 + $0xb8] sm:$0xff] }
  0x17   :  { %v34_v24 = vld [vmem:[%s1518_s0 + $0xb0] sm:$0xff]  ;;  %v37_v25 = vld [vmem:[%s1518_s0 + $0xc8] sm:$0xff]  ;;  %v36_v26 = vld [vmem:[%s1518_s0 + $0xc0] sm:$0xff]  ;;  %v399_v63 = vsub.s32 0, %v1286_v60  ;;  %v467_v3 = vsub.s32 1, %v1286_v60 }
  0x18   :  { %v39_v27 = vld [vmem:[%s1518_s0 + $0xd8] sm:$0xff]  ;;  %v38_v28 = vld [vmem:[%s1518_s0 + $0xd0] sm:$0xff]  ;;  %v41_v29 = vld [vmem:[%s1518_s0 + $0xe8] sm:$0xff] }
  0x19   :  { %v40_v30 = vld [vmem:[%s1518_s0 + $0xe0] sm:$0xff]  ;;  %v43_v31 = vld [vmem:[%s1518_s0 + $0xf8] sm:$0xff]  ;;  %v42_v32 = vld [vmem:[%s1518_s0 + $0xf0] sm:$0xff] }
  0x1a   :  { %144 = vperm.xlu1 %942, %v25_v13   ;;  %139 = vperm.xlu0 %941, %v24_v14   ;;  %v45_v33 = vld [vmem:[%s1518_s0 + $0x108] sm:$0xff]  ;;  %v44_v34 = vld [vmem:[%s1518_s0 + $0x100] sm:$0xff]  ;;  %v47_v35 = vld [vmem:[%s1518_s0 + $0x118] sm:$0xff] }
  0x1b   :  { %v46_v36 = vld [vmem:[%s1518_s0 + $0x110] sm:$0xff]  ;;  %v49_v37 = vld [vmem:[%s1518_s0 + $0x128] sm:$0xff]  ;;  %v48_v38 = vld [vmem:[%s1518_s0 + $0x120] sm:$0xff] }
  0x1c   :  { %v51_v39 = vld [vmem:[%s1518_s0 + $0x138] sm:$0xff]  ;;  %v50_v40 = vld [vmem:[%s1518_s0 + $0x130] sm:$0xff]  ;;  %v53_v41 = vld [vmem:[%s1518_s0 + $0x148] sm:$0xff] }
  0x1d   :  { %v52_v42 = vld [vmem:[%s1518_s0 + $0x140] sm:$0xff]  ;;  %v55_v43 = vld [vmem:[%s1518_s0 + $0x158] sm:$0xff]  ;;  %v54_v44 = vld [vmem:[%s1518_s0 + $0x150] sm:$0xff] }
  0x1e   :  { %154 = vperm.xlu1 %942, %v27_v15   ;;  %149 = vperm.xlu0 %941, %v26_v16   ;;  %v57_v45 = vld [vmem:[%s1518_s0 + $0x168] sm:$0xff]  ;;  %v56_v46 = vld [vmem:[%s1518_s0 + $0x160] sm:$0xff]  ;;  %v59_v47 = vld [vmem:[%s1518_s0 + $0x178] sm:$0xff] }
  0x1f   :  { %v58_v48 = vld [vmem:[%s1518_s0 + $0x170] sm:$0xff]  ;;  %v61_v49 = vld [vmem:[%s1518_s0 + $0x188] sm:$0xff]  ;;  %v60_v50 = vld [vmem:[%s1518_s0 + $0x180] sm:$0xff] }
  0x20   :  { %v63_v51 = vld [vmem:[%s1518_s0 + $0x198] sm:$0xff]  ;;  %v62_v52 = vld [vmem:[%s1518_s0 + $0x190] sm:$0xff]  ;;  %v65_v53 = vld [vmem:[%s1518_s0 + $0x1a8] sm:$0xff] }
  0x21   :  { %v64_v54 = vld [vmem:[%s1518_s0 + $0x1a0] sm:$0xff]  ;;  %v67_v55 = vld [vmem:[%s1518_s0 + $0x1b8] sm:$0xff]  ;;  %v66_v56 = vld [vmem:[%s1518_s0 + $0x1b0] sm:$0xff] }
  0x22   :  { %164 = vperm.xlu1 %942, %v29_v17   ;;  %159 = vperm.xlu0 %941, %v28_v18   ;;  %v69_v58 = vld [vmem:[%s1518_s0 + $0x1c8] sm:$0xff]  ;;  %v68_v59 = vld [vmem:[%s1518_s0 + $0x1c0] sm:$0xff]  ;;  %v71_v61 = vld [vmem:[%s1518_s0 + $0x1d8] sm:$0xff] }
  0x23   :  { %v70_v62 = vld [vmem:[%s1518_s0 + $0x1d0] sm:$0xff]  ;;  %v73_v0 = vld [vmem:[%s1518_s0 + $0x1e8] sm:$0xff]  ;;  %v72_v1 = vld [vmem:[%s1518_s0 + $0x1e0] sm:$0xff] }
  0x24   :  { %v1304_v2 = vld [vmem:[%s1519_s1] sm:$0xff]  ;;  %v75_v5 = vld [vmem:[%s1518_s0 + $0x1f8] sm:$0xff]  ;;  %v74_v6 = vld [vmem:[%s1518_s0 + $0x1f0] sm:$0xff]  ;;  %s1094_s0 = smov [#allocation2]  }
  0x25   :  { %v1308_v4 = vrot.slane %v1304_v2, %v399_v63  ;;  %v1317_v7 = vrot.slane %v1304_v2, %v467_v3  ;;  %s926_s1 = sshll.u32 %s1094_s0, 4  ;;  %s927_s1 = int_to_ptr.vmem [resolvable:$true] %s926_s1 }
  0x26   :  { %174 = vperm.xlu1 %942, %v31_v19   ;;  %169 = vperm.xlu0 %941, %v30_v20   ;;  %s1071_s27 = scalar_lea.vmem %s927_s1, 8192  ;;  %p1076_p1 = scmp.lt.s32.totalorder %s927_s1, %s927_s1 }
  0x27   :  { %p1072_p0 = scmp.ne.s32.totalorder %s927_s1, %s1071_s27  ;;  %p1077_p2 = scmp.lt.s32.totalorder %s1071_s27, %s1071_s27 }
  0x29   :  { %p1078_p3 = por %p1077_p2, %p1076_p1 }
  0x2a   :  { %184 = vperm.xlu1 %942, %v33_v21   ;;  %179 = vperm.xlu0 %941, %v32_v22  }
  0x2b   :  { %p1079_p4 = pnand %p1078_p3, %p1072_p0 }
  0x2e   :  { %194 = vperm.xlu1 %942, %v35_v23   ;;  %189 = vperm.xlu0 %941, %v34_v24  }
  0x32   :  { %204 = vperm.xlu1 %942, %v37_v25   ;;  %199 = vperm.xlu0 %941, %v36_v26  }
  0x36   :  { %214 = vperm.xlu1 %942, %v39_v27   ;;  %209 = vperm.xlu0 %941, %v38_v28  }
  0x3a   :  { %224 = vperm.xlu1 %942, %v41_v29   ;;  %219 = vperm.xlu0 %941, %v40_v30  }
  0x3e   :  { %234 = vperm.xlu1 %942, %v43_v31   ;;  %229 = vperm.xlu0 %941, %v42_v32  }
  0x42   :  { %244 = vperm.xlu1 %942, %v45_v33   ;;  %239 = vperm.xlu0 %941, %v44_v34  }
  0x46   :  { %254 = vperm.xlu1 %942, %v47_v35   ;;  %249 = vperm.xlu0 %941, %v46_v36  }
  0x4a   :  { %264 = vperm.xlu1 %942, %v49_v37   ;;  %259 = vperm.xlu0 %941, %v48_v38  }
  0x4e   :  { %274 = vperm.xlu1 %942, %v51_v39   ;;  %269 = vperm.xlu0 %941, %v50_v40  }
  0x52   :  { %284 = vperm.xlu1 %942, %v53_v41   ;;  %279 = vperm.xlu0 %941, %v52_v42  }
  0x56   :  { %294 = vperm.xlu1 %942, %v55_v43   ;;  %289 = vperm.xlu0 %941, %v54_v44  }
  0x5a   :  { %304 = vperm.xlu1 %942, %v57_v45   ;;  %299 = vperm.xlu0 %941, %v56_v46   ;;  %v791_v46 = vsub.s32 2, %v1286_v60 }
  0x5c   :  { %v1341_v60 = vrot.slane %v1304_v2, %v791_v46 }
  0x5e   :  { %314 = vperm.xlu1 %942, %v59_v47   ;;  %309 = vperm.xlu0 %941, %v58_v48  }
  0x62   :  { %324 = vperm.xlu1 %942, %v61_v49   ;;  %319 = vperm.xlu0 %941, %v60_v50  }
  0x66   :  { %334 = vperm.xlu1 %942, %v63_v51   ;;  %329 = vperm.xlu0 %941, %v62_v52  }
  0x6a   :  { %344 = vperm.xlu1 %942, %v65_v53   ;;  %339 = vperm.xlu0 %941, %v64_v54  }
  0x6e   :  { %354 = vperm.xlu1 %942, %v67_v55   ;;  %349 = vperm.xlu0 %941, %v66_v56  }
  0x72   :  { %364 = vperm.xlu1 %942, %v69_v58   ;;  %359 = vperm.xlu0 %941, %v68_v59  }
  0x76   :  { %374 = vperm.xlu1 %942, %v71_v61   ;;  %369 = vperm.xlu0 %941, %v70_v62  }
  0x7a   :  { %384 = vperm.xlu1 %942, %v73_v0   ;;  %379 = vperm.xlu0 %941, %v72_v1  }
  0x7d   :  { %v90_v8 = vpop.permute.xlu1 %89  ;;  %v80_v9 = vpop.permute.xlu0 %79 }
  0x7e   :  { %v403_v10 = vmul.f32 %v1308_v4, %v90_v8  ;;  %v401_v11 = vmul.f32 %v1308_v4, %v80_v9  ;;  %394 = vperm.xlu1 %942, %v75_v5   ;;  %389 = vperm.xlu0 %941, %v74_v6  }
  0x80   :  { %v471_v12 = vadd.f32 %v1317_v7, %v403_v10  ;;  %v469_v13 = vadd.f32 %v1317_v7, %v401_v11 }
  0x81   :  { %v95_v14 = vpop.permute.xlu1 %94  ;;  %v85_v15 = vpop.permute.xlu0 %84 }
  0x82   :  { %v535_v16 = vmul.f32 %v471_v12, %v471_v12  ;;  %v533_v17 = vmul.f32 %v469_v13, %v469_v13  ;;  %v404_v18 = vmul.f32 %v1308_v4, %v95_v14  ;;  %v402_v19 = vmul.f32 %v1308_v4, %v85_v15 }
  0x84   :  { %v599_v20 = vsub.f32 0.0, %v535_v16  ;;  %v597_v21 = vsub.f32 0.0, %v533_v17  ;;  %v472_v22 = vadd.f32 %v1317_v7, %v404_v18  ;;  %v470_v23 = vadd.f32 %v1317_v7, %v402_v19 }
  0x85   :  { %v105_v24 = vpop.permute.xlu1 %104  ;;  %v100_v25 = vpop.permute.xlu0 %99 }
  0x86   :  { %v665_v26 = vmul.f32 1.442695, %v599_v20  ;;  %v661_v27 = vmul.f32 1.442695, %v597_v21  ;;  %v536_v28 = vmul.f32 %v472_v22, %v472_v22  ;;  %v534_v29 = vmul.f32 %v470_v23, %v470_v23 }
  0x87   :  { %v406_v30 = vmul.f32 %v1308_v4, %v105_v24  ;;  %v405_v31 = vmul.f32 %v1308_v4, %v100_v25 }
  0x88   :  { %943 = vpow2.f32 %v665_v26  ;;  %v600_v32 = vsub.f32 0.0, %v536_v28  ;;  %v598_v33 = vsub.f32 0.0, %v534_v29 }
  0x89   :  { %945 = vpow2.f32 %v661_v27  ;;  %v474_v34 = vadd.f32 %v1317_v7, %v406_v30  ;;  %v473_v35 = vadd.f32 %v1317_v7, %v405_v31  ;;  %v115_v36 = vpop.permute.xlu1 %114  ;;  %v110_v37 = vpop.permute.xlu0 %109 }
  0x8a   :  { %v667_v38 = vmul.f32 1.442695, %v600_v32  ;;  %v663_v39 = vmul.f32 1.442695, %v598_v33  ;;  %v408_v40 = vmul.f32 %v1308_v4, %v115_v36  ;;  %v407_v41 = vmul.f32 %v1308_v4, %v110_v37 }
  0x8b   :  { %v538_v42 = vmul.f32 %v474_v34, %v474_v34  ;;  %v537_v43 = vmul.f32 %v473_v35, %v473_v35 }
  0x8c   :  { %947 = vpow2.f32 %v667_v38  ;;  %v476_v44 = vadd.f32 %v1317_v7, %v408_v40  ;;  %v475_v45 = vadd.f32 %v1317_v7, %v407_v41 }
  0x8d   :  { %949 = vpow2.f32 %v663_v39  ;;  %v602_v47 = vsub.f32 0.0, %v538_v42  ;;  %v601_v48 = vsub.f32 0.0, %v537_v43  ;;  %v125_v49 = vpop.permute.xlu1 %124  ;;  %v120_v50 = vpop.permute.xlu0 %119 }
  0x8e   :  { %v540_v51 = vmul.f32 %v476_v44, %v476_v44  ;;  %v539_v52 = vmul.f32 %v475_v45, %v475_v45  ;;  %v410_v53 = vmul.f32 %v1308_v4, %v125_v49  ;;  %v409_v54 = vmul.f32 %v1308_v4, %v120_v50 }
  0x8f   :  { %v671_v55 = vmul.f32 1.442695, %v602_v47  ;;  %v669_v56 = vmul.f32 1.442695, %v601_v48 }
  0x90   :  { %v604_v57 = vsub.f32 0.0, %v540_v51  ;;  %v603_v58 = vsub.f32 0.0, %v539_v52  ;;  %v478_v59 = vadd.f32 %v1317_v7, %v410_v53  ;;  %v477_v61 = vadd.f32 %v1317_v7, %v409_v54 }
  0x91   :  { %951 = vpow2.f32 %v671_v55  ;;  %v135_v62 = vpop.permute.xlu1 %134  ;;  %v130_v63 = vpop.permute.xlu0 %129 }
  0x92   :  { %953 = vpow2.f32 %v669_v56  ;;  %v675_v0 = vmul.f32 1.442695, %v604_v57  ;;  %v673_v1 = vmul.f32 1.442695, %v603_v58  ;;  %v542_v3 = vmul.f32 %v478_v59, %v478_v59 }
  0x93   :  { %v541_v5 = vmul.f32 %v477_v61, %v477_v61  ;;  %v412_v6 = vmul.f32 %v1308_v4, %v135_v62  ;;  %v411_v8 = vmul.f32 %v1308_v4, %v130_v63 }
  0x94   :  { %955 = vpow2.f32 %v675_v0  ;;  %v606_v9 = vsub.f32 0.0, %v542_v3 }
  0x95   :  { %v944_v10 = vpop.eup %943  ;;  %957 = vpow2.f32 %v673_v1  ;;  %v605_v11 = vsub.f32 0.0, %v541_v5  ;;  %v480_v2 = vadd.f32 %v1317_v7, %v412_v6  ;;  %v479_v12 = vadd.f32 %v1317_v7, %v411_v8  ;;  %v145_v13 = vpop.permute.xlu1 %144 }
  0x96   :  { %v140_v14 = vpop.permute.xlu0 %139  ;;  %v946_v15 = vpop.eup %945  ;;  %v795_v16 = vmul.f32 %v944_v10, %v1341_v60  ;;  %v679_v17 = vmul.f32 1.442695, %v606_v9  ;;  %v414_v18 = vmul.f32 %v1308_v4, %v145_v13 }
  0x97   :  { %v413_v19 = vmul.f32 %v1308_v4, %v140_v14  ;;  %v793_v20 = vmul.f32 %v946_v15, %v1341_v60  ;;  %v677_v21 = vmul.f32 1.442695, %v605_v11  ;;  %v544_v22 = vmul.f32 %v480_v2, %v480_v2 }
  0x98   :  { %v543_v23 = vmul.f32 %v479_v12, %v479_v12  ;;  %859 = vst [vmem:[#allocation2 + $0x10] sm:$0xff] %v795_v16  ;;  %959 = vpow2.f32 %v679_v17  ;;  %v482_v24 = vadd.f32 %v1317_v7, %v414_v18 }
  0x99   :  { %v481_v25 = vadd.f32 %v1317_v7, %v413_v19  ;;  %v948_v26 = vpop.eup %947  ;;  %857 = vst [vmem:[#allocation2] sm:$0xff] %v793_v20  ;;  %961 = vpow2.f32 %v677_v21  ;;  %v608_v27 = vsub.f32 0.0, %v544_v22  ;;  %v155_v29 = vpop.permute.xlu1 %154 }
  0x9a   :  { %v607_v28 = vsub.f32 0.0, %v543_v23  ;;  %v150_v30 = vpop.permute.xlu0 %149  ;;  %v950_v31 = vpop.eup %949  ;;  %v796_v32 = vmul.f32 %v948_v26, %v1341_v60  ;;  %v546_v33 = vmul.f32 %v482_v24, %v482_v24  ;;  %v416_v35 = vmul.f32 %v1308_v4, %v155_v29 }
  0x9b   :  { %v545_v34 = vmul.f32 %v481_v25, %v481_v25  ;;  %v794_v36 = vmul.f32 %v950_v31, %v1341_v60  ;;  %v683_v37 = vmul.f32 1.442695, %v608_v27  ;;  %v415_v39 = vmul.f32 %v1308_v4, %v150_v30 }
  0x9c   :  { %v681_v38 = vmul.f32 1.442695, %v607_v28  ;;  %860 = vst [vmem:[#allocation2 + $0x18] sm:$0xff] %v796_v32  ;;  %v610_v40 = vsub.f32 0.0, %v546_v33  ;;  %v484_v42 = vadd.f32 %v1317_v7, %v416_v35 }
  0x9d   :  { %v609_v41 = vsub.f32 0.0, %v545_v34  ;;  %858 = vst [vmem:[#allocation2 + $0x8] sm:$0xff] %v794_v36  ;;  %963 = vpow2.f32 %v683_v37  ;;  %v483_v43 = vadd.f32 %v1317_v7, %v415_v39  ;;  %v165_v44 = vpop.permute.xlu1 %164 }
  0x9e   :  { %v160_v45 = vpop.permute.xlu0 %159  ;;  %v952_v46 = vpop.eup %951  ;;  %965 = vpow2.f32 %v681_v38  ;;  %v687_v47 = vmul.f32 1.442695, %v610_v40  ;;  %v548_v49 = vmul.f32 %v484_v42, %v484_v42  ;;  %v418_v53 = vmul.f32 %v1308_v4, %v165_v44 }
  0x9f   :  { %v685_v48 = vmul.f32 1.442695, %v609_v41  ;;  %v954_v50 = vpop.eup %953  ;;  %v798_v51 = vmul.f32 %v952_v46, %v1341_v60  ;;  %v547_v52 = vmul.f32 %v483_v43, %v483_v43  ;;  %v417_v54 = vmul.f32 %v1308_v4, %v160_v45 }
  0xa0   :  { %v797_v55 = vmul.f32 %v954_v50, %v1341_v60  ;;  %967 = vpow2.f32 %v687_v47  ;;  %v612_v56 = vsub.f32 0.0, %v548_v49  ;;  %v486_v59 = vadd.f32 %v1317_v7, %v418_v53 }
  0xa1   :  { %v956_v57 = vpop.eup %955  ;;  %862 = vst [vmem:[#allocation2 + $0x28] sm:$0xff] %v798_v51  ;;  %969 = vpow2.f32 %v685_v48  ;;  %v611_v58 = vsub.f32 0.0, %v547_v52  ;;  %v485_v61 = vadd.f32 %v1317_v7, %v417_v54  ;;  %v175_v62 = vpop.permute.xlu1 %174 }
  0xa2   :  { %v170_v63 = vpop.permute.xlu0 %169  ;;  %v958_v0 = vpop.eup %957  ;;  %861 = vst [vmem:[#allocation2 + $0x20] sm:$0xff] %v797_v55  ;;  %v800_v1 = vmul.f32 %v956_v57, %v1341_v60  ;;  %v691_v3 = vmul.f32 1.442695, %v612_v56  ;;  %v420_v5 = vmul.f32 %v1308_v4, %v175_v62  ;;  %v550_v10 = vmul.f32 %v486_v59, %v486_v59 }
  0xa3   :  { %v419_v6 = vmul.f32 %v1308_v4, %v170_v63  ;;  %v799_v8 = vmul.f32 %v958_v0, %v1341_v60  ;;  %v689_v9 = vmul.f32 1.442695, %v611_v58  ;;  %v549_v11 = vmul.f32 %v485_v61, %v485_v61 }
  0xa4   :  { %864 = vst [vmem:[#allocation2 + $0x38] sm:$0xff] %v800_v1  ;;  %971 = vpow2.f32 %v691_v3  ;;  %v488_v2 = vadd.f32 %v1317_v7, %v420_v5  ;;  %v614_v14 = vsub.f32 0.0, %v550_v10 }
  0xa5   :  { %v487_v12 = vadd.f32 %v1317_v7, %v419_v6  ;;  %v960_v13 = vpop.eup %959  ;;  %863 = vst [vmem:[#allocation2 + $0x30] sm:$0xff] %v799_v8  ;;  %973 = vpow2.f32 %v689_v9  ;;  %v613_v15 = vsub.f32 0.0, %v549_v11  ;;  %v185_v16 = vpop.permute.xlu1 %184 }
  0xa6   :  { %v180_v17 = vpop.permute.xlu0 %179  ;;  %v962_v18 = vpop.eup %961  ;;  %v802_v19 = vmul.f32 %v960_v13, %v1341_v60  ;;  %v552_v20 = vmul.f32 %v488_v2, %v488_v2  ;;  %v422_v22 = vmul.f32 %v1308_v4, %v185_v16  ;;  %v695_v24 = vmul.f32 1.442695, %v614_v14 }
  0xa7   :  { %v551_v21 = vmul.f32 %v487_v12, %v487_v12  ;;  %v801_v23 = vmul.f32 %v962_v18, %v1341_v60  ;;  %v693_v25 = vmul.f32 1.442695, %v613_v15  ;;  %v421_v26 = vmul.f32 %v1308_v4, %v180_v17 }
  0xa8   :  { %866 = vst [vmem:[#allocation2 + $0x48] sm:$0xff] %v802_v19  ;;  %v616_v27 = vsub.f32 0.0, %v552_v20  ;;  %v490_v29 = vadd.f32 %v1317_v7, %v422_v22  ;;  %975 = vpow2.f32 %v695_v24 }
  0xa9   :  { %v615_v28 = vsub.f32 0.0, %v551_v21  ;;  %865 = vst [vmem:[#allocation2 + $0x40] sm:$0xff] %v801_v23  ;;  %v489_v30 = vadd.f32 %v1317_v7, %v421_v26  ;;  %v195_v31 = vpop.permute.xlu1 %194  ;;  %977 = vpow2.f32 %v693_v25 }
  0xaa   :  { %v190_v32 = vpop.permute.xlu0 %189  ;;  %v964_v33 = vpop.eup %963  ;;  %v699_v34 = vmul.f32 1.442695, %v616_v27  ;;  %v554_v36 = vmul.f32 %v490_v29, %v490_v29  ;;  %v424_v40 = vmul.f32 %v1308_v4, %v195_v31 }
  0xab   :  { %v697_v35 = vmul.f32 1.442695, %v615_v28  ;;  %v966_v37 = vpop.eup %965  ;;  %v804_v38 = vmul.f32 %v964_v33, %v1341_v60  ;;  %v553_v39 = vmul.f32 %v489_v30, %v489_v30  ;;  %v423_v41 = vmul.f32 %v1308_v4, %v190_v32 }
  0xac   :  { %v803_v42 = vmul.f32 %v966_v37, %v1341_v60  ;;  %979 = vpow2.f32 %v699_v34  ;;  %v618_v43 = vsub.f32 0.0, %v554_v36  ;;  %v492_v46 = vadd.f32 %v1317_v7, %v424_v40 }
  0xad   :  { %v968_v44 = vpop.eup %967  ;;  %868 = vst [vmem:[#allocation2 + $0x58] sm:$0xff] %v804_v38  ;;  %981 = vpow2.f32 %v697_v35  ;;  %v617_v45 = vsub.f32 0.0, %v553_v39  ;;  %v491_v47 = vadd.f32 %v1317_v7, %v423_v41  ;;  %v205_v48 = vpop.permute.xlu1 %204 }
  0xae   :  { %v200_v49 = vpop.permute.xlu0 %199  ;;  %v970_v50 = vpop.eup %969  ;;  %867 = vst [vmem:[#allocation2 + $0x50] sm:$0xff] %v803_v42  ;;  %v806_v51 = vmul.f32 %v968_v44, %v1341_v60  ;;  %v703_v52 = vmul.f32 1.442695, %v618_v43  ;;  %v426_v53 = vmul.f32 %v1308_v4, %v205_v48  ;;  %v556_v57 = vmul.f32 %v492_v46, %v492_v46 }
  0xaf   :  { %v425_v54 = vmul.f32 %v1308_v4, %v200_v49  ;;  %v805_v55 = vmul.f32 %v970_v50, %v1341_v60  ;;  %v701_v56 = vmul.f32 1.442695, %v617_v45  ;;  %v555_v58 = vmul.f32 %v491_v47, %v491_v47 }
  0xb0   :  { %870 = vst [vmem:[#allocation2 + $0x68] sm:$0xff] %v806_v51  ;;  %983 = vpow2.f32 %v703_v52  ;;  %v494_v59 = vadd.f32 %v1317_v7, %v426_v53  ;;  %v620_v63 = vsub.f32 0.0, %v556_v57 }
  0xb1   :  { %v493_v61 = vadd.f32 %v1317_v7, %v425_v54  ;;  %v972_v62 = vpop.eup %971  ;;  %869 = vst [vmem:[#allocation2 + $0x60] sm:$0xff] %v805_v55  ;;  %985 = vpow2.f32 %v701_v56  ;;  %v619_v0 = vsub.f32 0.0, %v555_v58  ;;  %v215_v1 = vpop.permute.xlu1 %214 }
  0xb2   :  { %v210_v3 = vpop.permute.xlu0 %209  ;;  %v974_v5 = vpop.eup %973  ;;  %v808_v6 = vmul.f32 %v972_v62, %v1341_v60  ;;  %v558_v8 = vmul.f32 %v494_v59, %v494_v59  ;;  %v428_v10 = vmul.f32 %v1308_v4, %v215_v1  ;;  %v707_v2 = vmul.f32 1.442695, %v620_v63 }
  0xb3   :  { %v557_v9 = vmul.f32 %v493_v61, %v493_v61  ;;  %v807_v11 = vmul.f32 %v974_v5, %v1341_v60  ;;  %v705_v12 = vmul.f32 1.442695, %v619_v0  ;;  %v427_v13 = vmul.f32 %v1308_v4, %v210_v3 }
  0xb4   :  { %872 = vst [vmem:[#allocation2 + $0x78] sm:$0xff] %v808_v6  ;;  %v622_v14 = vsub.f32 0.0, %v558_v8  ;;  %v496_v16 = vadd.f32 %v1317_v7, %v428_v10  ;;  %987 = vpow2.f32 %v707_v2 }
  0xb5   :  { %v621_v15 = vsub.f32 0.0, %v557_v9  ;;  %871 = vst [vmem:[#allocation2 + $0x70] sm:$0xff] %v807_v11  ;;  %v495_v17 = vadd.f32 %v1317_v7, %v427_v13  ;;  %v225_v18 = vpop.permute.xlu1 %224  ;;  %v976_v20 = vpop.eup %975  ;;  %989 = vpow2.f32 %v705_v12 }
  0xb6   :  { %v220_v19 = vpop.permute.xlu0 %219  ;;  %v711_v21 = vmul.f32 1.442695, %v622_v14  ;;  %v560_v23 = vmul.f32 %v496_v16, %v496_v16  ;;  %v978_v24 = vpop.eup %977  ;;  %v810_v25 = vmul.f32 %v976_v20, %v1341_v60  ;;  %v430_v27 = vmul.f32 %v1308_v4, %v225_v18 }
  0xb7   :  { %v709_v22 = vmul.f32 1.442695, %v621_v15  ;;  %v559_v26 = vmul.f32 %v495_v17, %v495_v17  ;;  %v429_v28 = vmul.f32 %v1308_v4, %v220_v19  ;;  %v809_v29 = vmul.f32 %v978_v24, %v1341_v60 }
  0xb8   :  { %991 = vpow2.f32 %v711_v21  ;;  %v624_v30 = vsub.f32 0.0, %v560_v23  ;;  %874 = vst [vmem:[#allocation2 + $0x88] sm:$0xff] %v810_v25  ;;  %v498_v33 = vadd.f32 %v1317_v7, %v430_v27 }
  0xb9   :  { %v980_v31 = vpop.eup %979  ;;  %993 = vpow2.f32 %v709_v22  ;;  %v623_v32 = vsub.f32 0.0, %v559_v26  ;;  %v497_v34 = vadd.f32 %v1317_v7, %v429_v28  ;;  %v235_v35 = vpop.permute.xlu1 %234  ;;  %873 = vst [vmem:[#allocation2 + $0x80] sm:$0xff] %v809_v29 }
  0xba   :  { %v230_v36 = vpop.permute.xlu0 %229  ;;  %v982_v37 = vpop.eup %981  ;;  %v812_v38 = vmul.f32 %v980_v31, %v1341_v60  ;;  %v715_v39 = vmul.f32 1.442695, %v624_v30  ;;  %v432_v40 = vmul.f32 %v1308_v4, %v235_v35  ;;  %v562_v44 = vmul.f32 %v498_v33, %v498_v33 }
  0xbb   :  { %v431_v41 = vmul.f32 %v1308_v4, %v230_v36  ;;  %v811_v42 = vmul.f32 %v982_v37, %v1341_v60  ;;  %v713_v43 = vmul.f32 1.442695, %v623_v32  ;;  %v561_v45 = vmul.f32 %v497_v34, %v497_v34 }
  0xbc   :  { %876 = vst [vmem:[#allocation2 + $0x98] sm:$0xff] %v812_v38  ;;  %995 = vpow2.f32 %v715_v39  ;;  %v500_v46 = vadd.f32 %v1317_v7, %v432_v40  ;;  %v626_v49 = vsub.f32 0.0, %v562_v44 }
  0xbd   :  { %v499_v47 = vadd.f32 %v1317_v7, %v431_v41  ;;  %v984_v48 = vpop.eup %983  ;;  %875 = vst [vmem:[#allocation2 + $0x90] sm:$0xff] %v811_v42  ;;  %997 = vpow2.f32 %v713_v43  ;;  %v625_v50 = vsub.f32 0.0, %v561_v45  ;;  %v245_v51 = vpop.permute.xlu1 %244 }
  0xbe   :  { %v240_v52 = vpop.permute.xlu0 %239  ;;  %v986_v53 = vpop.eup %985  ;;  %v814_v54 = vmul.f32 %v984_v48, %v1341_v60  ;;  %v564_v55 = vmul.f32 %v500_v46, %v500_v46  ;;  %v434_v57 = vmul.f32 %v1308_v4, %v245_v51  ;;  %v719_v59 = vmul.f32 1.442695, %v626_v49 }
  0xbf   :  { %v563_v56 = vmul.f32 %v499_v47, %v499_v47  ;;  %v813_v58 = vmul.f32 %v986_v53, %v1341_v60  ;;  %v717_v61 = vmul.f32 1.442695, %v625_v50  ;;  %v433_v62 = vmul.f32 %v1308_v4, %v240_v52 }
  0xc0   :  { %878 = vst [vmem:[#allocation2 + $0xa8] sm:$0xff] %v814_v54  ;;  %v628_v63 = vsub.f32 0.0, %v564_v55  ;;  %v502_v1 = vadd.f32 %v1317_v7, %v434_v57  ;;  %999 = vpow2.f32 %v719_v59 }
  0xc1   :  { %v627_v0 = vsub.f32 0.0, %v563_v56  ;;  %877 = vst [vmem:[#allocation2 + $0xa0] sm:$0xff] %v813_v58  ;;  %v501_v3 = vadd.f32 %v1317_v7, %v433_v62  ;;  %v255_v5 = vpop.permute.xlu1 %254  ;;  %v988_v8 = vpop.eup %987  ;;  %1001 = vpow2.f32 %v717_v61 }
  0xc2   :  { %v250_v6 = vpop.permute.xlu0 %249  ;;  %v723_v9 = vmul.f32 1.442695, %v628_v63  ;;  %v566_v11 = vmul.f32 %v502_v1, %v502_v1  ;;  %v990_v2 = vpop.eup %989  ;;  %v816_v12 = vmul.f32 %v988_v8, %v1341_v60  ;;  %v436_v14 = vmul.f32 %v1308_v4, %v255_v5 }
  0xc3   :  { %v721_v10 = vmul.f32 1.442695, %v627_v0  ;;  %v565_v13 = vmul.f32 %v501_v3, %v501_v3  ;;  %v435_v15 = vmul.f32 %v1308_v4, %v250_v6  ;;  %v815_v16 = vmul.f32 %v990_v2, %v1341_v60 }
  0xc4   :  { %1003 = vpow2.f32 %v723_v9  ;;  %v630_v17 = vsub.f32 0.0, %v566_v11  ;;  %880 = vst [vmem:[#allocation2 + $0xb8] sm:$0xff] %v816_v12  ;;  %v504_v20 = vadd.f32 %v1317_v7, %v436_v14 }
  0xc5   :  { %v992_v18 = vpop.eup %991  ;;  %1005 = vpow2.f32 %v721_v10  ;;  %v629_v19 = vsub.f32 0.0, %v565_v13  ;;  %v503_v21 = vadd.f32 %v1317_v7, %v435_v15  ;;  %v265_v22 = vpop.permute.xlu1 %264  ;;  %879 = vst [vmem:[#allocation2 + $0xb0] sm:$0xff] %v815_v16 }
  0xc6   :  { %v260_v23 = vpop.permute.xlu0 %259  ;;  %v994_v24 = vpop.eup %993  ;;  %v818_v25 = vmul.f32 %v992_v18, %v1341_v60  ;;  %v727_v26 = vmul.f32 1.442695, %v630_v17  ;;  %v438_v27 = vmul.f32 %v1308_v4, %v265_v22  ;;  %v568_v31 = vmul.f32 %v504_v20, %v504_v20 }
  0xc7   :  { %v437_v28 = vmul.f32 %v1308_v4, %v260_v23  ;;  %v817_v29 = vmul.f32 %v994_v24, %v1341_v60  ;;  %v725_v30 = vmul.f32 1.442695, %v629_v19  ;;  %v567_v32 = vmul.f32 %v503_v21, %v503_v21 }
  0xc8   :  { %882 = vst [vmem:[#allocation2 + $0xc8] sm:$0xff] %v818_v25  ;;  %1007 = vpow2.f32 %v727_v26  ;;  %v506_v33 = vadd.f32 %v1317_v7, %v438_v27  ;;  %v632_v36 = vsub.f32 0.0, %v568_v31 }
  0xc9   :  { %v505_v34 = vadd.f32 %v1317_v7, %v437_v28  ;;  %v996_v35 = vpop.eup %995  ;;  %881 = vst [vmem:[#allocation2 + $0xc0] sm:$0xff] %v817_v29  ;;  %1009 = vpow2.f32 %v725_v30  ;;  %v631_v37 = vsub.f32 0.0, %v567_v32  ;;  %v275_v38 = vpop.permute.xlu1 %274 }
  0xca   :  { %v270_v39 = vpop.permute.xlu0 %269  ;;  %v998_v40 = vpop.eup %997  ;;  %v820_v41 = vmul.f32 %v996_v35, %v1341_v60  ;;  %v570_v42 = vmul.f32 %v506_v33, %v506_v33  ;;  %v440_v44 = vmul.f32 %v1308_v4, %v275_v38  ;;  %v731_v46 = vmul.f32 1.442695, %v632_v36 }
  0xcb   :  { %v569_v43 = vmul.f32 %v505_v34, %v505_v34  ;;  %v819_v45 = vmul.f32 %v998_v40, %v1341_v60  ;;  %v729_v47 = vmul.f32 1.442695, %v631_v37  ;;  %v439_v48 = vmul.f32 %v1308_v4, %v270_v39 }
  0xcc   :  { %884 = vst [vmem:[#allocation2 + $0xd8] sm:$0xff] %v820_v41  ;;  %v634_v49 = vsub.f32 0.0, %v570_v42  ;;  %v508_v51 = vadd.f32 %v1317_v7, %v440_v44  ;;  %1011 = vpow2.f32 %v731_v46 }
  0xcd   :  { %v633_v50 = vsub.f32 0.0, %v569_v43  ;;  %883 = vst [vmem:[#allocation2 + $0xd0] sm:$0xff] %v819_v45  ;;  %v507_v52 = vadd.f32 %v1317_v7, %v439_v48  ;;  %v285_v53 = vpop.permute.xlu1 %284  ;;  %v1000_v55 = vpop.eup %999  ;;  %1013 = vpow2.f32 %v729_v47 }
  0xce   :  { %v280_v54 = vpop.permute.xlu0 %279  ;;  %v735_v56 = vmul.f32 1.442695, %v634_v49  ;;  %v572_v58 = vmul.f32 %v508_v51, %v508_v51  ;;  %v1002_v59 = vpop.eup %1001  ;;  %v822_v61 = vmul.f32 %v1000_v55, %v1341_v60  ;;  %v442_v63 = vmul.f32 %v1308_v4, %v285_v53 }
  0xcf   :  { %v733_v57 = vmul.f32 1.442695, %v633_v50  ;;  %v571_v62 = vmul.f32 %v507_v52, %v507_v52  ;;  %v441_v0 = vmul.f32 %v1308_v4, %v280_v54  ;;  %v821_v1 = vmul.f32 %v1002_v59, %v1341_v60 }
  0xd0   :  { %1015 = vpow2.f32 %v735_v56  ;;  %v636_v3 = vsub.f32 0.0, %v572_v58  ;;  %886 = vst [vmem:[#allocation2 + $0xe8] sm:$0xff] %v822_v61  ;;  %v510_v8 = vadd.f32 %v1317_v7, %v442_v63 }
  0xd1   :  { %v1004_v5 = vpop.eup %1003  ;;  %1017 = vpow2.f32 %v733_v57  ;;  %v635_v6 = vsub.f32 0.0, %v571_v62  ;;  %v509_v9 = vadd.f32 %v1317_v7, %v441_v0  ;;  %v295_v10 = vpop.permute.xlu1 %294  ;;  %885 = vst [vmem:[#allocation2 + $0xe0] sm:$0xff] %v821_v1 }
  0xd2   :  { %v290_v11 = vpop.permute.xlu0 %289  ;;  %v1006_v2 = vpop.eup %1005  ;;  %v824_v12 = vmul.f32 %v1004_v5, %v1341_v60  ;;  %v739_v13 = vmul.f32 1.442695, %v636_v3  ;;  %v444_v14 = vmul.f32 %v1308_v4, %v295_v10  ;;  %v574_v18 = vmul.f32 %v510_v8, %v510_v8 }
  0xd3   :  { %v443_v15 = vmul.f32 %v1308_v4, %v290_v11  ;;  %v823_v16 = vmul.f32 %v1006_v2, %v1341_v60  ;;  %v737_v17 = vmul.f32 1.442695, %v635_v6  ;;  %v573_v19 = vmul.f32 %v509_v9, %v509_v9 }
  0xd4   :  { %888 = vst [vmem:[#allocation2 + $0xf8] sm:$0xff] %v824_v12  ;;  %1019 = vpow2.f32 %v739_v13  ;;  %v512_v20 = vadd.f32 %v1317_v7, %v444_v14  ;;  %v638_v23 = vsub.f32 0.0, %v574_v18 }
  0xd5   :  { %v511_v21 = vadd.f32 %v1317_v7, %v443_v15  ;;  %v1008_v22 = vpop.eup %1007  ;;  %887 = vst [vmem:[#allocation2 + $0xf0] sm:$0xff] %v823_v16  ;;  %1021 = vpow2.f32 %v737_v17  ;;  %v637_v24 = vsub.f32 0.0, %v573_v19  ;;  %v305_v25 = vpop.permute.xlu1 %304 }
  0xd6   :  { %v300_v26 = vpop.permute.xlu0 %299  ;;  %v1010_v27 = vpop.eup %1009  ;;  %v826_v28 = vmul.f32 %v1008_v22, %v1341_v60  ;;  %v576_v29 = vmul.f32 %v512_v20, %v512_v20  ;;  %v446_v31 = vmul.f32 %v1308_v4, %v305_v25  ;;  %v743_v33 = vmul.f32 1.442695, %v638_v23 }
  0xd7   :  { %v575_v30 = vmul.f32 %v511_v21, %v511_v21  ;;  %v825_v32 = vmul.f32 %v1010_v27, %v1341_v60  ;;  %v741_v34 = vmul.f32 1.442695, %v637_v24  ;;  %v445_v35 = vmul.f32 %v1308_v4, %v300_v26 }
  0xd8   :  { %890 = vst [vmem:[#allocation2 + $0x108] sm:$0xff] %v826_v28  ;;  %v640_v36 = vsub.f32 0.0, %v576_v29  ;;  %v514_v38 = vadd.f32 %v1317_v7, %v446_v31  ;;  %1023 = vpow2.f32 %v743_v33 }
  0xd9   :  { %v639_v37 = vsub.f32 0.0, %v575_v30  ;;  %889 = vst [vmem:[#allocation2 + $0x100] sm:$0xff] %v825_v32  ;;  %v513_v39 = vadd.f32 %v1317_v7, %v445_v35  ;;  %v315_v40 = vpop.permute.xlu1 %314  ;;  %v1012_v42 = vpop.eup %1011  ;;  %1025 = vpow2.f32 %v741_v34 }
  0xda   :  { %v310_v41 = vpop.permute.xlu0 %309  ;;  %v747_v43 = vmul.f32 1.442695, %v640_v36  ;;  %v578_v45 = vmul.f32 %v514_v38, %v514_v38  ;;  %v1014_v46 = vpop.eup %1013  ;;  %v828_v47 = vmul.f32 %v1012_v42, %v1341_v60  ;;  %v448_v49 = vmul.f32 %v1308_v4, %v315_v40 }
  0xdb   :  { %v745_v44 = vmul.f32 1.442695, %v639_v37  ;;  %v577_v48 = vmul.f32 %v513_v39, %v513_v39  ;;  %v447_v50 = vmul.f32 %v1308_v4, %v310_v41  ;;  %v827_v51 = vmul.f32 %v1014_v46, %v1341_v60 }
  0xdc   :  { %1027 = vpow2.f32 %v747_v43  ;;  %v642_v52 = vsub.f32 0.0, %v578_v45  ;;  %892 = vst [vmem:[#allocation2 + $0x118] sm:$0xff] %v828_v47  ;;  %v516_v55 = vadd.f32 %v1317_v7, %v448_v49 }
  0xdd   :  { %v1016_v53 = vpop.eup %1015  ;;  %1029 = vpow2.f32 %v745_v44  ;;  %v641_v54 = vsub.f32 0.0, %v577_v48  ;;  %v515_v56 = vadd.f32 %v1317_v7, %v447_v50  ;;  %v325_v57 = vpop.permute.xlu1 %324  ;;  %891 = vst [vmem:[#allocation2 + $0x110] sm:$0xff] %v827_v51 }
  0xde   :  { %v320_v58 = vpop.permute.xlu0 %319  ;;  %v1018_v59 = vpop.eup %1017  ;;  %v830_v61 = vmul.f32 %v1016_v53, %v1341_v60  ;;  %v751_v62 = vmul.f32 1.442695, %v642_v52  ;;  %v450_v63 = vmul.f32 %v1308_v4, %v325_v57  ;;  %v580_v5 = vmul.f32 %v516_v55, %v516_v55 }
  0xdf   :  { %v449_v0 = vmul.f32 %v1308_v4, %v320_v58  ;;  %v829_v1 = vmul.f32 %v1018_v59, %v1341_v60  ;;  %v749_v3 = vmul.f32 1.442695, %v641_v54  ;;  %v579_v6 = vmul.f32 %v515_v56, %v515_v56 }
  0xe0   :  { %894 = vst [vmem:[#allocation2 + $0x128] sm:$0xff] %v830_v61  ;;  %1031 = vpow2.f32 %v751_v62  ;;  %v518_v8 = vadd.f32 %v1317_v7, %v450_v63  ;;  %v644_v11 = vsub.f32 0.0, %v580_v5 }
  0xe1   :  { %v517_v9 = vadd.f32 %v1317_v7, %v449_v0  ;;  %v1020_v10 = vpop.eup %1019  ;;  %893 = vst [vmem:[#allocation2 + $0x120] sm:$0xff] %v829_v1  ;;  %1033 = vpow2.f32 %v749_v3  ;;  %v643_v2 = vsub.f32 0.0, %v579_v6  ;;  %v335_v12 = vpop.permute.xlu1 %334 }
  0xe2   :  { %v330_v13 = vpop.permute.xlu0 %329  ;;  %v1022_v14 = vpop.eup %1021  ;;  %v832_v15 = vmul.f32 %v1020_v10, %v1341_v60  ;;  %v582_v16 = vmul.f32 %v518_v8, %v518_v8  ;;  %v452_v18 = vmul.f32 %v1308_v4, %v335_v12  ;;  %v755_v20 = vmul.f32 1.442695, %v644_v11 }
  0xe3   :  { %v581_v17 = vmul.f32 %v517_v9, %v517_v9  ;;  %v831_v19 = vmul.f32 %v1022_v14, %v1341_v60  ;;  %v753_v21 = vmul.f32 1.442695, %v643_v2  ;;  %v451_v22 = vmul.f32 %v1308_v4, %v330_v13 }
  0xe4   :  { %896 = vst [vmem:[#allocation2 + $0x138] sm:$0xff] %v832_v15  ;;  %v646_v23 = vsub.f32 0.0, %v582_v16  ;;  %v520_v25 = vadd.f32 %v1317_v7, %v452_v18  ;;  %1035 = vpow2.f32 %v755_v20 }
  0xe5   :  { %v645_v24 = vsub.f32 0.0, %v581_v17  ;;  %895 = vst [vmem:[#allocation2 + $0x130] sm:$0xff] %v831_v19  ;;  %v519_v26 = vadd.f32 %v1317_v7, %v451_v22  ;;  %v345_v27 = vpop.permute.xlu1 %344  ;;  %v1024_v29 = vpop.eup %1023  ;;  %1037 = vpow2.f32 %v753_v21 }
  0xe6   :  { %v340_v28 = vpop.permute.xlu0 %339  ;;  %v759_v30 = vmul.f32 1.442695, %v646_v23  ;;  %v584_v32 = vmul.f32 %v520_v25, %v520_v25  ;;  %v1026_v33 = vpop.eup %1025  ;;  %v834_v34 = vmul.f32 %v1024_v29, %v1341_v60  ;;  %v454_v36 = vmul.f32 %v1308_v4, %v345_v27 }
  0xe7   :  { %v757_v31 = vmul.f32 1.442695, %v645_v24  ;;  %v583_v35 = vmul.f32 %v519_v26, %v519_v26  ;;  %v453_v37 = vmul.f32 %v1308_v4, %v340_v28  ;;  %v833_v38 = vmul.f32 %v1026_v33, %v1341_v60 }
  0xe8   :  { %1039 = vpow2.f32 %v759_v30  ;;  %v648_v39 = vsub.f32 0.0, %v584_v32  ;;  %898 = vst [vmem:[#allocation2 + $0x148] sm:$0xff] %v834_v34  ;;  %v522_v42 = vadd.f32 %v1317_v7, %v454_v36 }
  0xe9   :  { %v1028_v40 = vpop.eup %1027  ;;  %1041 = vpow2.f32 %v757_v31  ;;  %v647_v41 = vsub.f32 0.0, %v583_v35  ;;  %v521_v43 = vadd.f32 %v1317_v7, %v453_v37  ;;  %v355_v44 = vpop.permute.xlu1 %354  ;;  %897 = vst [vmem:[#allocation2 + $0x140] sm:$0xff] %v833_v38 }
  0xea   :  { %v350_v45 = vpop.permute.xlu0 %349  ;;  %v1030_v46 = vpop.eup %1029  ;;  %v836_v47 = vmul.f32 %v1028_v40, %v1341_v60  ;;  %v763_v48 = vmul.f32 1.442695, %v648_v39  ;;  %v456_v49 = vmul.f32 %v1308_v4, %v355_v44  ;;  %v586_v53 = vmul.f32 %v522_v42, %v522_v42 }
  0xeb   :  { %v455_v50 = vmul.f32 %v1308_v4, %v350_v45  ;;  %v835_v51 = vmul.f32 %v1030_v46, %v1341_v60  ;;  %v761_v52 = vmul.f32 1.442695, %v647_v41  ;;  %v585_v54 = vmul.f32 %v521_v43, %v521_v43 }
  0xec   :  { %900 = vst [vmem:[#allocation2 + $0x158] sm:$0xff] %v836_v47  ;;  %1043 = vpow2.f32 %v763_v48  ;;  %v524_v55 = vadd.f32 %v1317_v7, %v456_v49  ;;  %v650_v58 = vsub.f32 0.0, %v586_v53 }
  0xed   :  { %v523_v56 = vadd.f32 %v1317_v7, %v455_v50  ;;  %v1032_v57 = vpop.eup %1031  ;;  %899 = vst [vmem:[#allocation2 + $0x150] sm:$0xff] %v835_v51  ;;  %1045 = vpow2.f32 %v761_v52  ;;  %v649_v59 = vsub.f32 0.0, %v585_v54  ;;  %v365_v61 = vpop.permute.xlu1 %364 }
  0xee   :  { %v360_v62 = vpop.permute.xlu0 %359  ;;  %v1034_v63 = vpop.eup %1033  ;;  %v838_v0 = vmul.f32 %v1032_v57, %v1341_v60  ;;  %v588_v1 = vmul.f32 %v524_v55, %v524_v55  ;;  %v458_v5 = vmul.f32 %v1308_v4, %v365_v61  ;;  %v767_v8 = vmul.f32 1.442695, %v650_v58 }
  0xef   :  { %v587_v3 = vmul.f32 %v523_v56, %v523_v56  ;;  %v837_v6 = vmul.f32 %v1034_v63, %v1341_v60  ;;  %v765_v9 = vmul.f32 1.442695, %v649_v59  ;;  %v457_v10 = vmul.f32 %v1308_v4, %v360_v62 }
  0xf0   :  { %902 = vst [vmem:[#allocation2 + $0x168] sm:$0xff] %v838_v0  ;;  %v652_v11 = vsub.f32 0.0, %v588_v1  ;;  %v526_v12 = vadd.f32 %v1317_v7, %v458_v5  ;;  %1047 = vpow2.f32 %v767_v8 }
  0xf1   :  { %v651_v2 = vsub.f32 0.0, %v587_v3  ;;  %901 = vst [vmem:[#allocation2 + $0x160] sm:$0xff] %v837_v6  ;;  %v525_v13 = vadd.f32 %v1317_v7, %v457_v10  ;;  %v375_v14 = vpop.permute.xlu1 %374  ;;  %v1036_v16 = vpop.eup %1035  ;;  %1049 = vpow2.f32 %v765_v9 }
  0xf2   :  { %v370_v15 = vpop.permute.xlu0 %369  ;;  %v771_v17 = vmul.f32 1.442695, %v652_v11  ;;  %v590_v19 = vmul.f32 %v526_v12, %v526_v12  ;;  %v1038_v20 = vpop.eup %1037  ;;  %v840_v21 = vmul.f32 %v1036_v16, %v1341_v60  ;;  %v460_v23 = vmul.f32 %v1308_v4, %v375_v14 }
  0xf3   :  { %v769_v18 = vmul.f32 1.442695, %v651_v2  ;;  %v589_v22 = vmul.f32 %v525_v13, %v525_v13  ;;  %v459_v24 = vmul.f32 %v1308_v4, %v370_v15  ;;  %v839_v25 = vmul.f32 %v1038_v20, %v1341_v60 }
  0xf4   :  { %1051 = vpow2.f32 %v771_v17  ;;  %v654_v26 = vsub.f32 0.0, %v590_v19  ;;  %904 = vst [vmem:[#allocation2 + $0x178] sm:$0xff] %v840_v21  ;;  %v528_v29 = vadd.f32 %v1317_v7, %v460_v23 }
  0xf5   :  { %v1040_v27 = vpop.eup %1039  ;;  %1053 = vpow2.f32 %v769_v18  ;;  %v653_v28 = vsub.f32 0.0, %v589_v22  ;;  %v527_v30 = vadd.f32 %v1317_v7, %v459_v24  ;;  %v385_v31 = vpop.permute.xlu1 %384  ;;  %903 = vst [vmem:[#allocation2 + $0x170] sm:$0xff] %v839_v25 }
  0xf6   :  { %v380_v32 = vpop.permute.xlu0 %379  ;;  %v1042_v33 = vpop.eup %1041  ;;  %v842_v34 = vmul.f32 %v1040_v27, %v1341_v60  ;;  %v775_v35 = vmul.f32 1.442695, %v654_v26  ;;  %v462_v36 = vmul.f32 %v1308_v4, %v385_v31  ;;  %v592_v40 = vmul.f32 %v528_v29, %v528_v29 }
  0xf7   :  { %v461_v37 = vmul.f32 %v1308_v4, %v380_v32  ;;  %v841_v38 = vmul.f32 %v1042_v33, %v1341_v60  ;;  %v773_v39 = vmul.f32 1.442695, %v653_v28  ;;  %v591_v41 = vmul.f32 %v527_v30, %v527_v30 }
  0xf8   :  { %906 = vst [vmem:[#allocation2 + $0x188] sm:$0xff] %v842_v34  ;;  %1055 = vpow2.f32 %v775_v35  ;;  %v530_v42 = vadd.f32 %v1317_v7, %v462_v36  ;;  %v656_v45 = vsub.f32 0.0, %v592_v40 }
  0xf9   :  { %v529_v43 = vadd.f32 %v1317_v7, %v461_v37  ;;  %v1044_v44 = vpop.eup %1043  ;;  %905 = vst [vmem:[#allocation2 + $0x180] sm:$0xff] %v841_v38  ;;  %1057 = vpow2.f32 %v773_v39  ;;  %v655_v46 = vsub.f32 0.0, %v591_v41  ;;  %v395_v47 = vpop.permute.xlu1 %394 }
  0xfa   :  { %v390_v48 = vpop.permute.xlu0 %389  ;;  %v1046_v49 = vpop.eup %1045  ;;  %v844_v50 = vmul.f32 %v1044_v44, %v1341_v60  ;;  %v594_v51 = vmul.f32 %v530_v42, %v530_v42  ;;  %v464_v53 = vmul.f32 %v1308_v4, %v395_v47  ;;  %v779_v55 = vmul.f32 1.442695, %v656_v45 }
  0xfb   :  { %v593_v52 = vmul.f32 %v529_v43, %v529_v43  ;;  %v843_v54 = vmul.f32 %v1046_v49, %v1341_v60  ;;  %v777_v56 = vmul.f32 1.442695, %v655_v46  ;;  %v463_v57 = vmul.f32 %v1308_v4, %v390_v48 }
  0xfc   :  { %908 = vst [vmem:[#allocation2 + $0x198] sm:$0xff] %v844_v50  ;;  %v658_v58 = vsub.f32 0.0, %v594_v51  ;;  %v532_v61 = vadd.f32 %v1317_v7, %v464_v53  ;;  %1059 = vpow2.f32 %v779_v55 }
  0xfd   :  { %v657_v59 = vsub.f32 0.0, %v593_v52  ;;  %907 = vst [vmem:[#allocation2 + $0x190] sm:$0xff] %v843_v54  ;;  %v531_v62 = vadd.f32 %v1317_v7, %v463_v57  ;;  %v1048_v63 = vpop.eup %1047  ;;  %1061 = vpow2.f32 %v777_v56 }
  0xfe   :  { %v783_v0 = vmul.f32 1.442695, %v658_v58  ;;  %v596_v3 = vmul.f32 %v532_v61, %v532_v61  ;;  %v1050_v5 = vpop.eup %1049  ;;  %v846_v6 = vmul.f32 %v1048_v63, %v1341_v60 }
  0xff   :  { %v781_v1 = vmul.f32 1.442695, %v657_v59  ;;  %v595_v8 = vmul.f32 %v531_v62, %v531_v62  ;;  %v845_v4 = vmul.f32 %v1050_v5, %v1341_v60 }
 0x100   :  { %1063 = vpow2.f32 %v783_v0  ;;  %v660_v9 = vsub.f32 0.0, %v596_v3  ;;  %910 = vst [vmem:[#allocation2 + $0x1a8] sm:$0xff] %v846_v6 }
 0x101   :  { %v1052_v10 = vpop.eup %1051  ;;  %1065 = vpow2.f32 %v781_v1  ;;  %v659_v11 = vsub.f32 0.0, %v595_v8  ;;  %909 = vst [vmem:[#allocation2 + $0x1a0] sm:$0xff] %v845_v4 }
 0x102   :  { %v1054_v2 = vpop.eup %1053  ;;  %v848_v7 = vmul.f32 %v1052_v10, %v1341_v60  ;;  %v787_v12 = vmul.f32 1.442695, %v660_v9 }
 0x103   :  { %v847_v13 = vmul.f32 %v1054_v2, %v1341_v60  ;;  %v785_v14 = vmul.f32 1.442695, %v659_v11 }
 0x104   :  { %912 = vst [vmem:[#allocation2 + $0x1b8] sm:$0xff] %v848_v7  ;;  %1067 = vpow2.f32 %v787_v12 }
 0x105   :  { %v1056_v15 = vpop.eup %1055  ;;  %911 = vst [vmem:[#allocation2 + $0x1b0] sm:$0xff] %v847_v13  ;;  %1069 = vpow2.f32 %v785_v14 }
 0x106   :  { %v1058_v16 = vpop.eup %1057  ;;  %v850_v17 = vmul.f32 %v1056_v15, %v1341_v60 }
 0x107   :  { %v849_v18 = vmul.f32 %v1058_v16, %v1341_v60 }
 0x108   :  { %914 = vst [vmem:[#allocation2 + $0x1c8] sm:$0xff] %v850_v17 }
 0x109   :  { %913 = vst [vmem:[#allocation2 + $0x1c0] sm:$0xff] %v849_v18  ;;  %v1060_v19 = vpop.eup %1059 }
 0x10a   :  { %v1062_v20 = vpop.eup %1061  ;;  %v852_v21 = vmul.f32 %v1060_v19, %v1341_v60 }
 0x10b   :  { %v851_v22 = vmul.f32 %v1062_v20, %v1341_v60 }
 0x10c   :  { %916 = vst [vmem:[#allocation2 + $0x1d8] sm:$0xff] %v852_v21 }
 0x10d   :  { %v1064_v23 = vpop.eup %1063  ;;  %915 = vst [vmem:[#allocation2 + $0x1d0] sm:$0xff] %v851_v22 }
 0x10e   :  { %v1066_v24 = vpop.eup %1065  ;;  %v854_v25 = vmul.f32 %v1064_v23, %v1341_v60 }
 0x10f   :  { %v853_v26 = vmul.f32 %v1066_v24, %v1341_v60 }
 0x110   :  { %918 = vst [vmem:[#allocation2 + $0x1e8] sm:$0xff] %v854_v25 }
 0x111   :  { %v1068_v27 = vpop.eup %1067  ;;  %917 = vst [vmem:[#allocation2 + $0x1e0] sm:$0xff] %v853_v26 }
 0x112   :  { %v1070_v28 = vpop.eup %1069  ;;  %v856_v29 = vmul.f32 %v1068_v27, %v1341_v60 }
 0x113   :  { %v855_v30 = vmul.f32 %v1070_v28, %v1341_v60 }
 0x114   :  { %920 = vst [vmem:[#allocation2 + $0x1f8] sm:$0xff] %v856_v29 }
 0x115   :  { %919 = vst [vmem:[#allocation2 + $0x1f0] sm:$0xff] %v855_v30 }
 0x116   :  { %1082 = shalt.err (!%p1079_p4)
}
 0x117   :  { %s1095_s28 = smov 128   ;;  %s1096_s29 = smov 8  }
 0x118   :  { %932 = dma.vmem_to_hbm [thread:$0]  %s927_s1, 8192, %s1520_s2, [#allocation3], %s1095_s28, %s1095_s28, %s1096_s29  }
 0x119   :  { %1091 = dma.done.wait [#allocation3], 8192  }
 0x11a   :  { %1092 = vsyncadd [#allocation3], 4294959104 }
 0x11b   :  { %936 = vsyncpa [#allocation3], 1 }

</bundles_post_ra>
